<compile_context>
chip_gen: v7x
topology: tpu7x:2x2x1
jax: 0.10.0
libtpu: 0.0.40
codegen_flags: <defaults>
</compile_context>

<pallas_src>
import numpy as np
import jax
import jax.numpy as jnp
from jax.experimental import pallas as pl
from jax.experimental.pallas import tpu as pltpu

NPAD = 128            # lane-padded node dimension (nodes live on lanes)
NEG = -1e30           # large-negative sentinel (avoids inf-inf NaNs)


# ---------------------------------------------------------------- kernel ----

def _fused_forward_kernel(nn_ref, a_ref, g_ref, w_ref, out_ref):
    """One grid step == one graph.  Weights live in a single resident slab."""
    f32 = jnp.float32
    npad = a_ref.shape[-1]
    d = g_ref.shape[1] - 1              # input feature dim   (static)
    h = w_ref.shape[0] - 8              # hidden dim          (static)

    b = pl.program_id(0)
    n = nn_ref[b]                       # this graph's node count (SMEM scalar)

    a_t = a_ref[0]                      # (NPAD, NPAD) = A_hat^T, zero-padded
    g = g_ref[0]                        # (D+1, NPAD)  = [X^T ; ready row]
    x_t = g[0:d, :]                     # (D, NPAD)
    ready = g[d:d + 1, :] > 0.5         # (1, NPAD) bool

    # unpack the packed weight slab (static slices -> zero runtime cost)
    w = w_ref[...]                      # (H+8, WCOLS)
    c = d + 2 * h
    w1t, w2t, wp1t = w[0:h, 0:d], w[0:h, d:d + h], w[0:h, d + h:c]
    b1 = w[0:h, c:c + 1]
    b2 = w[0:h, c + 1:c + 2]
    bp1 = w[0:h, c + 2:c + 3]
    whead = w[h:h + 2, 0:h]             # (2, H): [W_mlp^T ; W_val^T]
    wp2r = w[h + 2:h + 3, 0:h]          # (1, H)
    bmlp = w[h + 3:h + 4, 0:1]          # (1, 1)
    bval = w[h + 3:h + 4, 1:2]
    bp2 = w[h + 3:h + 4, 2:3]

    # --- GCN stack in transposed layout: relu(W^T @ X^T @ A^T + b) ----------
    t = jnp.dot(w1t, x_t, preferred_element_type=f32)
    hid = jnp.maximum(jnp.dot(t, a_t, preferred_element_type=f32) + b1, 0.0)
    t = jnp.dot(w2t, hid, preferred_element_type=f32)
    hid = jnp.maximum(jnp.dot(t, a_t, preferred_element_type=f32) + b2, 0.0)
    # hid: (H, NPAD)

    lane = jax.lax.broadcasted_iota(jnp.int32, (1, npad), 1)
    valid = lane < n                                             # real nodes

    # --- policy + value heads folded into one (2,H)@(H,NPAD) matmul ---------
    head = jnp.dot(whead, hid, preferred_element_type=f32)       # (2, NPAD)
    node_logits = head[0:1, :] + bmlp                            # (1, NPAD)
    val_contrib = jnp.where(valid, head[1:2, :], 0.0)
    count = jnp.sum(jnp.where(valid, 1.0, 0.0), axis=-1, keepdims=True)
    value = jnp.sum(val_contrib, axis=-1, keepdims=True) / count + bval  # (1,1)

    # --- pass head: masked max over ready nodes, then 2-layer MLP -----------
    # relu output >= 0, so the clamp only guards the degenerate all-False mask.
    max_col = jnp.maximum(
        jnp.max(jnp.where(ready, hid, NEG), axis=-1, keepdims=True), -1e4)
    xp = jnp.maximum(jnp.dot(wp1t, max_col, preferred_element_type=f32) + bp1, 0.0)
    pass_logit = jnp.dot(wp2r, xp, preferred_element_type=f32) + bp2     # (1,1)

    # --- masked softmax over {ready nodes, pass} (pass sits at lane n) ------
    logits = jnp.where(ready, node_logits, NEG)
    logits = jnp.where(lane == n, pass_logit, logits)
    m = jnp.max(logits, axis=-1, keepdims=True)
    e = jnp.exp(logits - m)              # masked lanes underflow to exactly 0
    probs = e / jnp.sum(e, axis=-1, keepdims=True)
    # TODO(synk): pl.reciprocal(denom, approx=True) rides the free EUP slot on
    # v5e; kept exact to preserve the 1e-5 f32 parity check with the reference.

    # lane-dense output: lanes [0,n) node probs, lane n pass prob, last lane value
    out_ref[0] = jnp.where(lane == npad - 1, value, probs)


# -------------------------------------------------- host-side weight pack ---

def pack_weights(params):
    """Pack every weight/bias once into one resident (H+8, >=128) f32 slab."""
    f32 = jnp.float32
    d, h = params["W_g1"].shape
    wcols = max(d + 2 * h + 3, h, NPAD)
    wcols = ((wcols + 127) // 128) * 128
    c = d + 2 * h
    s = jnp.zeros((h + 8, wcols), f32)
    s = s.at[:h, 0:d].set(params["W_g1"].T)
    s = s.at[:h, d:d + h].set(params["W_g2"].T)
    s = s.at[:h, d + h:c].set(params["W_p1"].T)
    s = s.at[:h, c].set(params["b_g1"])
    s = s.at[:h, c + 1].set(params["b_g2"])
    s = s.at[:h, c + 2].set(params["b_p1"])
    s = s.at[h, 0:h].set(params["W_mlp"][:, 0])
    s = s.at[h + 1, 0:h].set(params["W_val"][:, 0])
    s = s.at[h + 2, 0:h].set(params["W_p2"][:, 0])
    s = s.at[h + 3, 0].set(params["b_mlp"][0])
    s = s.at[h + 3, 1].set(params["b_val"][0])
    s = s.at[h + 3, 2].set(params["b_p2"][0])
    return s


# ------------------------------------------------------- jitted forward -----

@jax.jit
def _forward_batched(w_slab, a_hat_b, x_b, ready_b, nn):
    """Layout prep + fused batched kernel, all under one jit (no eager glue)."""
    f32 = jnp.float32
    bsz, n_max, _ = a_hat_b.shape
    d = x_b.shape[-1]
    hp8, wcols = w_slab.shape
    h = hp8 - 8

    # transpose + lane-pad to NPAD nodes; ready mask rides in the X slab
    a_t = jnp.zeros((bsz, NPAD, NPAD), f32).at[:, :n_max, :n_max].set(
        jnp.swapaxes(a_hat_b, 1, 2))
    g = jnp.zeros((bsz, d + 1, NPAD), f32)
    g = g.at[:, :d, :n_max].set(jnp.swapaxes(x_b, 1, 2))
    g = g.at[:, d, :n_max].set(ready_b.astype(f32))
    nn = nn.astype(jnp.int32)

    flops = 2 * bsz * (h * d * NPAD + 2 * h * NPAD * NPAD + h * h * NPAD
                       + 2 * h * NPAD + h * h + h)
    bytes_acc = 4 * (bsz * (NPAD * NPAD + (d + 1) * NPAD + NPAD + 1)
                     + hp8 * wcols)

    out = pl.pallas_call(
        _fused_forward_kernel,
        out_shape=jax.ShapeDtypeStruct((bsz, 1, NPAD), f32),
        grid_spec=pltpu.PrefetchScalarGridSpec(
            num_scalar_prefetch=1,               # nn -> SMEM, no recompile per n
            grid=(bsz,),
            in_specs=[
                pl.BlockSpec((1, NPAD, NPAD), lambda i, nn_ref: (i, 0, 0)),
                pl.BlockSpec((1, d + 1, NPAD), lambda i, nn_ref: (i, 0, 0)),
                pl.BlockSpec((hp8, wcols), lambda i, nn_ref: (0, 0)),  # resident
            ],
            out_specs=pl.BlockSpec((1, 1, NPAD), lambda i, nn_ref: (i, 0, 0)),
        ),
        compiler_params=pltpu.CompilerParams(dimension_semantics=("parallel",)),
        cost_estimate=pl.CostEstimate(flops=flops, transcendentals=bsz * NPAD,
                                      bytes_accessed=bytes_acc),
    )(nn, a_t, g, w_slab)
    return out[:, 0, :]                                   # (B, NPAD)


def model_forward_batch(w_slab, a_hat_b, x_b, ready_b_np, nn_np):
    nn_np = np.asarray(nn_np, np.int32)
    ready_b_np = np.asarray(ready_b_np)
    assert int(nn_np.max()) < NPAD - 1, "node count must fit in lane-padded slab"
    out = jax.block_until_ready(
        _forward_batched(w_slab, a_hat_b, x_b,
                         jnp.asarray(ready_b_np.astype(np.float32)),
                         jnp.asarray(nn_np)))
    out_np = np.asarray(out)   # single device->host transfer for the batch
    # TODO(synk): torch boolean indexing x[ready] has data-dependent output
    # size; the gather of already-normalized probabilities is host numpy glue.
    probs_list, values = [], []
    for i in range(out_np.shape[0]):
        n = int(nn_np[i])
        idx = np.nonzero(ready_b_np[i, :n])[0]
        probs_list.append(np.concatenate([out_np[i, idx], out_np[i, n:n + 1]]))
        values.append(out_np[i, NPAD - 1:NPAD])
    return probs_list, values


# -------------------------------------------------------------- glue (JAX) --

def gcn_norm_dense(edge_index, edge_weight, num_nodes):
    # PyG gcn_norm (add_self_loops=True, improved=False, flow='target_to_source')
    loop = jnp.arange(num_nodes)
    row = jnp.concatenate([edge_index[0], loop])
    col = jnp.concatenate([edge_index[1], loop])
    w = jnp.concatenate([edge_weight, jnp.ones((num_nodes,), jnp.float32)])
    deg = jnp.zeros((num_nodes,), jnp.float32).at[row].add(w)
    dinv = jnp.where(deg > 0, deg ** -0.5, 0.0)
    norm = dinv[row] * w * dinv[col]
    return jnp.zeros((num_nodes, num_nodes), jnp.float32).at[row, col].add(norm)


def ref_forward(params, a_hat, x, ready_mask_np):
    h = jax.nn.relu(a_hat @ (x @ params["W_g1"]) + params["b_g1"])
    h = jax.nn.relu(a_hat @ (h @ params["W_g2"]) + params["b_g2"])
    idx = np.nonzero(np.asarray(ready_mask_np))[0]
    v = jnp.mean(h, axis=0) @ params["W_val"] + params["b_val"]
    node_logits = h @ params["W_mlp"] + params["b_mlp"]
    xp = jax.nn.relu(jnp.max(h[idx], axis=0) @ params["W_p1"] + params["b_p1"])
    pass_logit = xp @ params["W_p2"] + params["b_p2"]
    logits = jnp.concatenate([node_logits[idx, 0], pass_logit])
    return jax.nn.softmax(logits), v


# ------------------------------------------------------------------- main ---

if __name__ == "__main__":
    B, N, E = 4, 8, 16
    INPUT_DIM, HIDDEN = 16, 32

    key = jax.random.PRNGKey(0)
    ks = jax.random.split(key, B + 8)

    xs, ahats, readys = [], [], []
    for i in range(B):
        kx, ksrc, kdst, kw, kr = jax.random.split(ks[i], 5)
        xs.append(jax.random.normal(kx, (N, INPUT_DIM), jnp.float32))
        src = jax.random.randint(ksrc, (E,), 0, N)
        dst = jax.random.randint(kdst, (E,), 0, N)
        ew = jax.random.uniform(kw, (E,), jnp.float32, 0.5, 1.5)
        ahats.append(gcn_norm_dense(jnp.stack([src, dst]), ew, N))
        r = np.asarray(jax.random.uniform(kr, (N,)) > 0.5).copy()  # writable
        r[0] = True                     # ensure at least one ready node
        readys.append(r)
    x_b = jnp.stack(xs)
    a_b = jnp.stack(ahats)
    ready_b = np.stack(readys)
    nn = np.full((B,), N, np.int32)

    def glorot(k, shape):
        lim = float(np.sqrt(6.0 / (shape[0] + shape[1])))
        return jax.random.uniform(k, shape, jnp.float32, -lim, lim)

    pk = jax.random.split(ks[B], 12)
    params = {
        "W_g1": glorot(pk[0], (INPUT_DIM, HIDDEN)),
        "b_g1": jax.random.uniform(pk[1], (HIDDEN,), jnp.float32, -0.1, 0.1),
        "W_g2": glorot(pk[2], (HIDDEN, HIDDEN)),
        "b_g2": jax.random.uniform(pk[3], (HIDDEN,), jnp.float32, -0.1, 0.1),
        "W_mlp": glorot(pk[4], (HIDDEN, 1)),
        "b_mlp": jax.random.uniform(pk[5], (1,), jnp.float32, -0.1, 0.1),
        "W_val": glorot(pk[6], (HIDDEN, 1)),
        "b_val": jax.random.uniform(pk[7], (1,), jnp.float32, -0.1, 0.1),
        "W_p1": glorot(pk[8], (HIDDEN, HIDDEN)),
        "b_p1": jax.random.uniform(pk[9], (HIDDEN,), jnp.float32, -0.1, 0.1),
        "W_p2": glorot(pk[10], (HIDDEN, 1)),
        "b_p2": jax.random.uniform(pk[11], (1,), jnp.float32, -0.1, 0.1),
    }

    w_slab = pack_weights(params)        # one-time init-side packing

    probs_list, values = model_forward_batch(w_slab, a_b, x_b, ready_b, nn)

    for i in range(B):
        probs_ref, v_ref = ref_forward(params, a_b[i], x_b[i], readys[i])
        np.testing.assert_allclose(probs_list[i], np.asarray(probs_ref),
                                   rtol=1e-5, atol=1e-5)
        np.testing.assert_allclose(values[i], np.asarray(v_ref),
                                   rtol=1e-5, atol=1e-5)
        assert probs_list[i].shape == (int(readys[i].sum()) + 1,)
        assert values[i].shape == (1,)

    print("KERNEL_OK")
</pallas_src>

<mosaic_0001>
module attributes {stable_mosaic.version = 11 : i64} {
  func.func @_fused_forward_kernel(%arg0: i32, %arg1: memref<4xi32, #tpu.memory_space<smem>>, %arg2: memref<1x128x128xf32, #tpu.memory_space<vmem>>, %arg3: memref<1x17x128xf32, #tpu.memory_space<vmem>>, %arg4: memref<40x128xf32, #tpu.memory_space<vmem>>, %arg5: memref<1x1x128xf32, #tpu.memory_space<vmem>>) attributes {dimension_semantics = [#tpu.dimension_semantics<parallel>], iteration_bounds = array<i64: 4>, scalar_prefetch = 1 : i64, scratch_operands = 0 : i64, tpu.core_type = #tpu.core_type<tc>, window_params = [{transform_indices = @transform_0, window_bounds = array<i64: 1, 128, 128>}, {transform_indices = @transform_1, window_bounds = array<i64: 1, 17, 128>}, {pipeline_mode = #tpu.pipeline_mode<synchronous>, transform_indices = @transform_2, window_bounds = array<i64: 40, 128>}, {transform_indices = @transform_3, window_bounds = array<i64: 1, 1, 128>}]} {
    %0 = arith.index_cast %arg0 : i32 to index
    %1 = memref.load %arg1[%0] : memref<4xi32, #tpu.memory_space<smem>>
    %c0 = arith.constant 0 : index
    %c0_0 = arith.constant 0 : index
    %c0_1 = arith.constant 0 : index
    %2 = vector.load %arg2[%c0, %c0_0, %c0_1] : memref<1x128x128xf32, #tpu.memory_space<vmem>>, vector<1x128x128xf32>
    %3 = vector.shape_cast %2 : vector<1x128x128xf32> to vector<128x128xf32>
    %c0_2 = arith.constant 0 : index
    %c0_3 = arith.constant 0 : index
    %c0_4 = arith.constant 0 : index
    %4 = vector.load %arg3[%c0_2, %c0_3, %c0_4] : memref<1x17x128xf32, #tpu.memory_space<vmem>>, vector<1x17x128xf32>
    %5 = vector.shape_cast %4 : vector<1x17x128xf32> to vector<17x128xf32>
    %6 = vector.extract_strided_slice %5 {offsets = [0, 0], sizes = [16, 128], strides = [1, 1]} : vector<17x128xf32> to vector<16x128xf32>
    %7 = vector.extract_strided_slice %5 {offsets = [16, 0], sizes = [1, 128], strides = [1, 1]} : vector<17x128xf32> to vector<1x128xf32>
    %cst = arith.constant 5.000000e-01 : f32
    %8 = vector.broadcast %cst : f32 to vector<1x128xf32>
    %9 = arith.cmpf ogt, %7, %8 : vector<1x128xf32>
    %c0_5 = arith.constant 0 : index
    %c0_6 = arith.constant 0 : index
    %10 = vector.load %arg4[%c0_5, %c0_6] : memref<40x128xf32, #tpu.memory_space<vmem>>, vector<40x128xf32>
    %11 = vector.extract_strided_slice %10 {offsets = [0, 0], sizes = [32, 16], strides = [1, 1]} : vector<40x128xf32> to vector<32x16xf32>
    %12 = vector.extract_strided_slice %10 {offsets = [0, 16], sizes = [32, 32], strides = [1, 1]} : vector<40x128xf32> to vector<32x32xf32>
    %13 = vector.extract_strided_slice %10 {offsets = [0, 48], sizes = [32, 32], strides = [1, 1]} : vector<40x128xf32> to vector<32x32xf32>
    %14 = vector.extract_strided_slice %10 {offsets = [0, 80], sizes = [32, 1], strides = [1, 1]} : vector<40x128xf32> to vector<32x1xf32>
    %15 = vector.extract_strided_slice %10 {offsets = [0, 81], sizes = [32, 1], strides = [1, 1]} : vector<40x128xf32> to vector<32x1xf32>
    %16 = vector.extract_strided_slice %10 {offsets = [0, 82], sizes = [32, 1], strides = [1, 1]} : vector<40x128xf32> to vector<32x1xf32>
    %17 = vector.extract_strided_slice %10 {offsets = [32, 0], sizes = [2, 32], strides = [1, 1]} : vector<40x128xf32> to vector<2x32xf32>
    %18 = vector.extract_strided_slice %10 {offsets = [34, 0], sizes = [1, 32], strides = [1, 1]} : vector<40x128xf32> to vector<1x32xf32>
    %19 = vector.extract_strided_slice %10 {offsets = [35, 0], sizes = [1, 1], strides = [1, 1]} : vector<40x128xf32> to vector<1x1xf32>
    %20 = vector.extract_strided_slice %10 {offsets = [35, 1], sizes = [1, 1], strides = [1, 1]} : vector<40x128xf32> to vector<1x1xf32>
    %21 = vector.extract_strided_slice %10 {offsets = [35, 2], sizes = [1, 1], strides = [1, 1]} : vector<40x128xf32> to vector<1x1xf32>
    %cst_7 = arith.constant dense<0.000000e+00> : vector<32x128xf32>
    %22 = tpu.matmul %11, %6, %cst_7 {dimension_numbers = #tpu.dot_dimension_numbers<[1], [0], [0], [1], [0, 0, 1, 1], [], []>} : vector<32x16xf32>, vector<16x128xf32>, vector<32x128xf32> -> vector<32x128xf32>
    %cst_8 = arith.constant dense<0.000000e+00> : vector<32x128xf32>
    %23 = tpu.matmul %22, %3, %cst_8 {dimension_numbers = #tpu.dot_dimension_numbers<[1], [0], [0], [1], [0, 0, 1, 1], [], []>} : vector<32x128xf32>, vector<128x128xf32>, vector<32x128xf32> -> vector<32x128xf32>
    %24 = vector.broadcast %14 : vector<32x1xf32> to vector<32x128xf32>
    %25 = arith.addf %23, %24 : vector<32x128xf32>
    %cst_9 = arith.constant 0.000000e+00 : f32
    %26 = vector.broadcast %cst_9 : f32 to vector<32x128xf32>
    %27 = arith.maximumf %25, %26 : vector<32x128xf32>
    %cst_10 = arith.constant dense<0.000000e+00> : vector<32x128xf32>
    %28 = tpu.matmul %12, %27, %cst_10 {dimension_numbers = #tpu.dot_dimension_numbers<[1], [0], [0], [1], [0, 0, 1, 1], [], []>} : vector<32x32xf32>, vector<32x128xf32>, vector<32x128xf32> -> vector<32x128xf32>
    %cst_11 = arith.constant dense<0.000000e+00> : vector<32x128xf32>
    %29 = tpu.matmul %28, %3, %cst_11 {dimension_numbers = #tpu.dot_dimension_numbers<[1], [0], [0], [1], [0, 0, 1, 1], [], []>} : vector<32x128xf32>, vector<128x128xf32>, vector<32x128xf32> -> vector<32x128xf32>
    %30 = vector.broadcast %15 : vector<32x1xf32> to vector<32x128xf32>
    %31 = arith.addf %29, %30 : vector<32x128xf32>
    %cst_12 = arith.constant 0.000000e+00 : f32
    %32 = vector.broadcast %cst_12 : f32 to vector<32x128xf32>
    %33 = arith.maximumf %31, %32 : vector<32x128xf32>
    %34 = tpu.iota {dimensions = array<i32: 1>} : vector<1x128xi32>
    %35 = vector.broadcast %1 : i32 to vector<1x128xi32>
    %36 = arith.cmpi slt, %34, %35 : vector<1x128xi32>
    %cst_13 = arith.constant dense<0.000000e+00> : vector<2x128xf32>
    %37 = tpu.matmul %17, %33, %cst_13 {dimension_numbers = #tpu.dot_dimension_numbers<[1], [0], [0], [1], [0, 0, 1, 1], [], []>} : vector<2x32xf32>, vector<32x128xf32>, vector<2x128xf32> -> vector<2x128xf32>
    %38 = vector.extract_strided_slice %37 {offsets = [0, 0], sizes = [1, 128], strides = [1, 1]} : vector<2x128xf32> to vector<1x128xf32>
    %39 = vector.broadcast %19 : vector<1x1xf32> to vector<1x128xf32>
    %40 = arith.addf %38, %39 : vector<1x128xf32>
    %41 = vector.extract_strided_slice %37 {offsets = [1, 0], sizes = [1, 128], strides = [1, 1]} : vector<2x128xf32> to vector<1x128xf32>
    %cst_14 = arith.constant 0.000000e+00 : f32
    %42 = vector.broadcast %cst_14 : f32 to vector<1x128xf32>
    %43 = arith.select %36, %41, %42 : vector<1x128xi1>, vector<1x128xf32>
    %cst_15 = arith.constant 1.000000e+00 : f32
    %cst_16 = arith.constant 0.000000e+00 : f32
    %44 = vector.broadcast %cst_15 : f32 to vector<1x128xf32>
    %45 = vector.broadcast %cst_16 : f32 to vector<1x128xf32>
    %46 = arith.select %36, %44, %45 : vector<1x128xi1>, vector<1x128xf32>
    %cst_17 = arith.constant dense<0.000000e+00> : vector<1xf32>
    %47 = vector.multi_reduction <add>, %46, %cst_17 [1] : vector<1x128xf32> to vector<1xf32>
    %48 = vector.shape_cast %47 : vector<1xf32> to vector<1x1xf32>
    %cst_18 = arith.constant dense<0.000000e+00> : vector<1xf32>
    %49 = vector.multi_reduction <add>, %43, %cst_18 [1] : vector<1x128xf32> to vector<1xf32>
    %50 = vector.shape_cast %49 : vector<1xf32> to vector<1x1xf32>
    %51 = arith.divf %50, %48 : vector<1x1xf32>
    %52 = arith.addf %51, %20 : vector<1x1xf32>
    %cst_19 = arith.constant -1.000000e+30 : f32
    %53 = vector.shape_cast %9 : vector<1x128xi1> to vector<1x128xi1>
    %54 = vector.broadcast %53 : vector<1x128xi1> to vector<32x128xi1>
    %55 = vector.broadcast %cst_19 : f32 to vector<32x128xf32>
    %56 = arith.select %54, %33, %55 : vector<32x128xi1>, vector<32x128xf32>
    %cst_20 = arith.constant dense<0xFF800000> : vector<32xf32>
    %57 = vector.multi_reduction <maximumf>, %56, %cst_20 [1] : vector<32x128xf32> to vector<32xf32>
    %58 = vector.shape_cast %57 : vector<32xf32> to vector<32x1xf32>
    %cst_21 = arith.constant -1.000000e+04 : f32
    %59 = vector.broadcast %cst_21 : f32 to vector<32x1xf32>
    %60 = arith.maximumf %58, %59 : vector<32x1xf32>
    %cst_22 = arith.constant dense<0.000000e+00> : vector<32x1xf32>
    %61 = tpu.matmul %13, %60, %cst_22 {dimension_numbers = #tpu.dot_dimension_numbers<[1], [0], [0], [1], [0, 0, 1, 1], [], []>} : vector<32x32xf32>, vector<32x1xf32>, vector<32x1xf32> -> vector<32x1xf32>
    %62 = arith.addf %61, %16 : vector<32x1xf32>
    %cst_23 = arith.constant 0.000000e+00 : f32
    %63 = vector.broadcast %cst_23 : f32 to vector<32x1xf32>
    %64 = arith.maximumf %62, %63 : vector<32x1xf32>
    %cst_24 = arith.constant dense<0.000000e+00> : vector<1x1xf32>
    %65 = tpu.matmul %18, %64, %cst_24 {dimension_numbers = #tpu.dot_dimension_numbers<[1], [0], [0], [1], [0, 0, 1, 1], [], []>} : vector<1x32xf32>, vector<32x1xf32>, vector<1x1xf32> -> vector<1x1xf32>
    %66 = arith.addf %65, %21 : vector<1x1xf32>
    %cst_25 = arith.constant -1.000000e+30 : f32
    %67 = vector.broadcast %cst_25 : f32 to vector<1x128xf32>
    %68 = arith.select %9, %40, %67 : vector<1x128xi1>, vector<1x128xf32>
    %69 = vector.broadcast %1 : i32 to vector<1x128xi32>
    %70 = arith.cmpi eq, %34, %69 : vector<1x128xi32>
    %71 = vector.shape_cast %66 : vector<1x1xf32> to vector<1x1xf32>
    %72 = vector.broadcast %71 : vector<1x1xf32> to vector<1x128xf32>
    %73 = arith.select %70, %72, %68 : vector<1x128xi1>, vector<1x128xf32>
    %cst_26 = arith.constant dense<0xFF800000> : vector<1xf32>
    %74 = vector.multi_reduction <maximumf>, %73, %cst_26 [1] : vector<1x128xf32> to vector<1xf32>
    %75 = vector.shape_cast %74 : vector<1xf32> to vector<1x1xf32>
    %76 = vector.broadcast %75 : vector<1x1xf32> to vector<1x128xf32>
    %77 = arith.subf %73, %76 : vector<1x128xf32>
    %78 = math.exp %77 : vector<1x128xf32>
    %cst_27 = arith.constant dense<0.000000e+00> : vector<1xf32>
    %79 = vector.multi_reduction <add>, %78, %cst_27 [1] : vector<1x128xf32> to vector<1xf32>
    %80 = vector.shape_cast %79 : vector<1xf32> to vector<1x1xf32>
    %81 = vector.broadcast %80 : vector<1x1xf32> to vector<1x128xf32>
    %82 = arith.divf %78, %81 : vector<1x128xf32>
    %c127_i32 = arith.constant 127 : i32
    %83 = vector.broadcast %c127_i32 : i32 to vector<1x128xi32>
    %84 = arith.cmpi eq, %34, %83 : vector<1x128xi32>
    %85 = vector.shape_cast %52 : vector<1x1xf32> to vector<1x1xf32>
    %86 = vector.broadcast %85 : vector<1x1xf32> to vector<1x128xf32>
    %87 = arith.select %84, %86, %82 : vector<1x128xi1>, vector<1x128xf32>
    %c0_28 = arith.constant 0 : index
    %c0_29 = arith.constant 0 : index
    %c0_30 = arith.constant 0 : index
    %88 = vector.load %arg5[%c0_28, %c0_29, %c0_30] : memref<1x1x128xf32, #tpu.memory_space<vmem>>, vector<1x1x128xf32>
    %89 = vector.shape_cast %88 : vector<1x1x128xf32> to vector<1x128xf32>
    %90 = vector.shape_cast %87 : vector<1x128xf32> to vector<1x1x128xf32>
    tpu.vector_store %arg5[%c0_28, %c0_29, %c0_30], %90 {strides = array<i32>} : memref<1x1x128xf32, #tpu.memory_space<vmem>>, vector<1x1x128xf32>,
    return
  }
  func.func @transform_0(%arg0: i32, %arg1: memref<4xi32, #tpu.memory_space<smem>>) -> (i32, i32, i32) {
    %c0_i32 = arith.constant 0 : i32
    %c0_i32_0 = arith.constant 0 : i32
    %c0_i32_1 = arith.constant 0 : i32
    return %arg0, %c0_i32, %c0_i32_0 : i32, i32, i32
  }
  func.func @transform_1(%arg0: i32, %arg1: memref<4xi32, #tpu.memory_space<smem>>) -> (i32, i32, i32) {
    %c0_i32 = arith.constant 0 : i32
    %c0_i32_0 = arith.constant 0 : i32
    %c0_i32_1 = arith.constant 0 : i32
    return %arg0, %c0_i32, %c0_i32_0 : i32, i32, i32
  }
  func.func @transform_2(%arg0: i32, %arg1: memref<4xi32, #tpu.memory_space<smem>>) -> (i32, i32) {
    %c0_i32 = arith.constant 0 : i32
    %c0_i32_0 = arith.constant 0 : i32
    %c0_i32_1 = arith.constant 0 : i32
    return %c0_i32, %c0_i32_0 : i32, i32
  }
  func.func @transform_3(%arg0: i32, %arg1: memref<4xi32, #tpu.memory_space<smem>>) -> (i32, i32, i32) {
    %c0_i32 = arith.constant 0 : i32
    %c0_i32_0 = arith.constant 0 : i32
    %c0_i32_1 = arith.constant 0 : i32
    return %arg0, %c0_i32, %c0_i32_0 : i32, i32, i32
  }
}

</mosaic_0001>

<bundles_post_ra>
// kernel: _forward_batched.1
= control target key start
LH: loop header
LB: loop body
LE: loop exit
PB: predicated region body
PF: predicated region fallthrough
CT: control target
= control target key end

     0   :  { %s1848_s0 = inlined_call_operand.vmem [shape: s32[4], index: 0, kind: input, shape index: {}]   ;;  %s1849_s1 = inlined_call_operand.vmem [shape: f32[4,128,128], index: 1, kind: input, shape index: {}]   ;;  %s1850_s2 = inlined_call_operand.vmem [shape: f32[4,17,128], index: 2, kind: input, shape index: {}]   ;;  %s1851_s3 = inlined_call_operand.vmem [shape: f32[40,128], index: 3, kind: input, shape index: {}]   ;;  %s1852_s4 = inlined_call_operand.hbm [shape: f32[4,1,128], index: 4, kind: output, shape index: {}]  }
   0x1   :  { %s9_s17 = sshll.u32 %s1848_s0, 4  ;;  %s10_s17 = int_to_ptr.vmem [resolvable:$true] %s9_s17 }
   0x2   :  { %s1448_s18 = scalar_lea.vmem %s10_s17, 16  ;;  %p1453_p1 = scmp.lt.s32.totalorder %s10_s17, %s10_s17 }
   0x3   :  { %p1449_p0 = scmp.ne.s32.totalorder %s10_s17, %s1448_s18  ;;  %p1454_p2 = scmp.lt.s32.totalorder %s1448_s18, %s1448_s18 }
   0x5   :  { %p1455_p3 = por %p1454_p2, %p1453_p1 }
   0x7   :  { %p1456_p4 = pnand %p1455_p3, %p1449_p0 }
   0x9   :  { %1459 = shalt.err (!%p1456_p4)  }
   0xa   :  { %s1526_s19 = smov [#allocation3]  }
   0xb   :  { %12 = dma.vmem_to_smem %s10_s17, 16, %s1526_s19, [#allocation2] }
   0xc   :  { %1504 = dma.done.wait [#allocation2], 16 }
   0xd   :  { %1505 = vsyncadd [#allocation2], 4294967280 }
   0xe   :  { %14 = sfence }
   0xf   :  { %15 = vsyncpa [#allocation5], 0 }
  0x10   :  { %17 = vsyncpa [#allocation5 + $0x1], 0  ;;  %s1567_s20 = smov 0   ;;  %s1569_s21 = smov 0  }
  0x11   :  { %s1571_s0 = smov 0   ;;  %s1573_s22 = smov 0  }
  0x12 LB: > { %s1588_s23 = sadd.s32 4294967295, %s1524_s22   ;;  %s1055_s24 = sadd.s32 4294967294, %s1524_s22   ;;  %s1524_s22 = sphi %s1573_s22, %s1860_s22   ;;  %s1520_s0 = sphi %s1571_s0, %s1859_s0   ;;  %s1516_s21 = sphi %s1569_s21, %s1858_s21   ;;  %s1512_s20 = sphi %s1567_s20, %s1857_s20  }
  0x13   : > { %s1592_s25 = sadd.s32 1, %s1524_s22   ;;  %s103_s26 = sadd.s32 1, %s1520_s0 }
  0x14   : > { %s100_s27 = ssub.s32 %s1524_s22, %s1592_s25  ;;  %p113_p5 = scmp.ne.s32.totalorder %s1520_s0, %s1516_s21 }
  0x15   : > { %p101_p6 = scmp.eq.s32.totalorder %s100_s27, 0  ;;  %p114_p7 = scmp.eq.s32.totalorder %s1588_s23, 3 }
  0x16   : > { %p119_p8 = scmp.ne.s32.totalorder %s1516_s21, %s1512_s20  ;;  %p120_p9 = scmp.eq.s32.totalorder %s1055_s24, 3 }
  0x17   : > { %s1603_s28 = scalar_select %p101_p6, %s1520_s0, %s103_s26  }
  0x18   : > { %p1605_p10 = por %p114_p7, %p113_p5  ;;  %p1609_p11 = por %p120_p9, %p119_p8 }
  0x19   : > { %p1058_p12 = scmp.ge.s32.totalorder %s1524_s22, 1  ;;  %p157_p13 = scmp.lt.s32.totalorder %s1524_s22, 5 }
  0x1b   : > { %p158_p0 = pnand %p1058_p12, %p157_p13 }
  0x1c   : > { %p185_p1 = scmp.lt.s32.totalorder (!%p158_p0), %s1588_s23, 3  ;;  %v1619_v0 = vld [vmem:[%s1851_s3] sm:$0xff] (!%p158_p0)  ;;  %vm221_vm0 = vcmask (!%p158_p0), 130048   ;;  %v1651_v12 = vld [vmem:[%s1851_s3 + $0x8] sm:$0xff] (!%p158_p0)  ;;  %v1659_v14 = vld [vmem:[%s1851_s3 + $0x10] sm:$0xff] (!%p158_p0)  ;;  %v1527_v31 = vmov (!%p158_p0), 80  }
  0x1d   : > { %161 = sbr.rel (%p158_p0) target bundleno = 1975 (0x7b7), region = 32  ;;  %1156 = vmatprep.mubr.msk.f32.mxu0 (!%p158_p0), %vm221_vm0, %v1619_v0  ;;  %v1671_v17 = vld [vmem:[%s1851_s3 + $0x18] sm:$0xff] (!%p158_p0)  ;;  %1436 = vset.pattern.permute.xlu0 (!%p158_p0), %v1527_v31  ;;  %s1528_s27 = smov (!%p158_p0), 112   ;;  %vm432_vm1 = vcmask (!%p158_p0), 261120   ;;  %v1529_v58 = vmov (!%p158_p0), 81   ;;  %v1531_v63 = vmov (!%p158_p0), 0  }
  0x1e   : > { %1437 = vset.pattern.permute.xlu1 (!%p158_p0), %v1527_v31  ;;  %320 = vperm.xlu0 (!%p158_p0), %1436, %v1619_v0   ;;  %s1530_s5 = smov (!%p158_p0), 80   ;;  %vm1533_vm2 = vmmov (!%p158_p0), 0   ;;  %vm718_vm6 = vcmask (!%p158_p0), 1041409   ;;  %s1536_s10 = smov (!%p158_p0), 126   ;;  %vm952_vm8 = vcmask (!%p158_p0), 1040384  }
  0x1f   : > { %328 = vperm.xlu1 (!%p158_p0), %1437, %v1659_v14   ;;  %s1537_s11 = smov (!%p158_p0), 127   ;;  %s1076_s13 = sshll.u32 (!%p158_p0), %s1588_s23, 4 }
  0x20   : > { %s1806_s18 = scalar_lea.hbm (!%p158_p0), %s1852_s4, %s1076_s13  ;;  %s1538_s24 = smov (!%p158_p0), [#allocation4]  }
  0x21   : > { %s1464_s26 = sshll.u32 (!%p158_p0), %s1538_s24, 4  ;;  %s1465_s26 = int_to_ptr.vmem [resolvable:$false] %s1464_s26 }
  0x22   : > { %324 = vperm.xlu0 (!%p158_p0), %1436, %v1651_v12  }
  0x23   : > { %332 = vperm.xlu1 (!%p158_p0), %1437, %v1671_v17  }
  0x24   : > { %s186_s7 = scalar_select %p185_p1, %s1588_s23, 3 }
  0x26   : > { %s1079_s8 = sshll.u32 %s186_s7, 7  ;;  %s1384_s9 = smul.u32 24, %s186_s7  ;;  %424 = vrot.lane.b32.xlu0 %v1619_v0, %s1528_s27 }
  0x27   : > { %s1627_s12 = scalar_lea.vmem %s1849_s1, %s1079_s8  ;;  %426 = vrot.lane.b32.xlu1 %v1651_v12, %s1528_s27  ;;  %1438 = vset.pattern.permute.xlu0 %v1529_v58  ;;  %s1535_s8 = smov 46  }
  0x28   : > { %s1632_s15 = scalar_lea.vmem %s1850_s2, %s1384_s9  ;;  %v196_v1 = vld [vmem:[%s1627_s12] sm:$0xff]  ;;  %v197_v2 = vld [vmem:[%s1627_s12 + $0x8] sm:$0xff]  ;;  %v198_v3 = vld [vmem:[%s1627_s12 + $0x10] sm:$0xff]  ;;  %1439 = vset.pattern.permute.xlu1 %v1529_v58  ;;  %s1772_s9 = sld [smem:[#allocation3 + %s1588_s23]] }
  0x29   : > { %v212_v4 = vld [vmem:[%s1632_s15] sm:$0xff]  ;;  %v213_v5 = vld [vmem:[%s1632_s15 + $0x8] sm:$0xff]  ;;  %v1639_v6 = vpack.c.bf16 %v197_v2, %v196_v1  ;;  %v199_v8 = vld [vmem:[%s1627_s12 + $0x18] sm:$0xff]  ;;  %v1532_v1 = vmov 0.0|0.0   ;;  %v1534_v2 = vmov 0.0  }
  0x2a   : > { %v1288_v7 = vpack.c.bf16 %v213_v5, %v212_v4  ;;  %v200_v9 = vld [vmem:[%s1627_s12 + $0x20] sm:$0xff]  ;;  %v201_v10 = vld [vmem:[%s1627_s12 + $0x28] sm:$0xff]  ;;  %v1645_v11 = vpack.c.bf16 %v199_v8, %v198_v3  ;;  %v202_v15 = vld [vmem:[%s1627_s12 + $0x30] sm:$0xff]  ;;  %428 = vrot.lane.b32.xlu0 %v1659_v14, %s1528_s27  ;;  %v631_v3 = vlaneseq }
  0x2b   : > { %1293 = vmatprep.subr.bf16.mxu1 %v1639_v6  ;;  %v1654_v13 = vpack.c.bf16 %v201_v10, %v200_v9  ;;  %v203_v16 = vld [vmem:[%s1627_s12 + $0x38] sm:$0xff]  ;;  %v204_v19 = vld [vmem:[%s1627_s12 + $0x40] sm:$0xff]  ;;  %v205_v20 = vld [vmem:[%s1627_s12 + $0x48] sm:$0xff]  ;;  %430 = vrot.lane.b32.xlu1 %v1671_v17, %s1528_s27  ;;  %s1466_s27 = scalar_lea.vmem %s1465_s26, 32 }
  0x2c   : > { %1289 = vmatprep.subr.bf16.mxu0 %v1288_v7  ;;  %1295 = vmatpush3.bf16.msra.mxu1 %v1639_v6  ;;  %v1674_v18 = vpack.c.bf16 %v203_v16, %v202_v15  ;;  %v1682_v21 = vpack.c.bf16 %v205_v20, %v204_v19  ;;  %v206_v22 = vld [vmem:[%s1627_s12 + $0x50] sm:$0xff]  ;;  %v207_v23 = vld [vmem:[%s1627_s12 + $0x58] sm:$0xff]  ;;  %v208_v25 = vld [vmem:[%s1627_s12 + $0x60] sm:$0xff]  ;;  %v731_v5 = vshrl.u32 %v631_v3, 7 }
  0x2d   : > { %1291 = vmatpush3.bf16.msra.mxu0 %v1288_v7  ;;  %1297 = vmatprep.subr.bf16.mxu1 %v1645_v11  ;;  %v1688_v24 = vpack.c.bf16 %v207_v23, %v206_v22  ;;  %v209_v26 = vld [vmem:[%s1627_s12 + $0x68] sm:$0xff]  ;;  %v210_v28 = vld [vmem:[%s1627_s12 + $0x70] sm:$0xff]  ;;  %v211_v29 = vld [vmem:[%s1627_s12 + $0x78] sm:$0xff]  ;;  %s183_s12 = sand.u32 1, %s1516_s21  }
  0x2e   : > { %v1694_v27 = vpack.c.bf16 %v209_v26, %v208_v25  ;;  %v1700_v30 = vpack.c.bf16 %v211_v29, %v210_v28  ;;  %527 = vperm.xlu0 %1438, %v1619_v0   ;;  %v1744_v4 = vld [vmem:[%s1632_s15 + $0x10] sm:$0x1]  ;;  %s184_s14 = scalar_lea.vmem [#allocation4], %s183_s12  ;;  %s976_s19 = scalar_lea.sflag [#allocation5], %s183_s12 }
  0x2f   : > { %531 = vperm.xlu1 %1439, %v1651_v12   ;;  %vm215_vm3 = vcmp.gt.f32.partialorder %v1744_v4, 0.5  ;;  %s988_s15 = sshll.u32 %s184_s14, 4  ;;  %s1808_s15 = int_to_ptr.vmem [resolvable:$true] %s988_s15 }
  0x30   : > { %1157 = vmatmul.mubr.msk.f32.vlgmr.msra.gmra.mrb[0].mxu0 %vm221_vm0, %v1651_v12  ;;  %1299 = vmatpush3.bf16.msra.mxu1 %v1645_v11  ;;  %v729_v7 = vsel %vm215_vm3, 1, %v1531_v63  ;;  %s1460_s23 = scalar_lea.vmem %s1808_s15, 16  ;;  %p1467_p5 = scmp.lt.s32.totalorder %s1808_s15, %s1465_s26 }
  0x31   : > { %1159 = vmatprep.mubr.msk.f32.mxu0 %vm221_vm0, %v1659_v14  ;;  %1301 = vmatprep.subr.bf16.mxu1 %v1654_v13  ;;  %p1461_p2 = scmp.ne.s32.totalorder %s1808_s15, %s1460_s23  ;;  %p1468_p6 = scmp.lt.s32.totalorder %s1466_s27, %s1460_s23 }
  0x32   : > { %539 = vperm.xlu0 %1438, %v1671_v17  }
  0x33   : > { %535 = vperm.xlu1 %1439, %v1659_v14   ;;  %p1462_p3 = pnand %p1461_p2, %p1605_p10  ;;  %p1469_p7 = por %p1468_p6, %p1467_p5 }
  0x34   : > { %1160 = vmatmul.mubr.msk.f32.gmra.mrb[2].mxu0 %vm221_vm0, %v1671_v17  ;;  %1303 = vmatpush3.bf16.msra.mxu1 %v1654_v13 }
  0x35   : > { %1305 = vmatprep.subr.bf16.mxu1 %v1674_v18  ;;  %p1463_p4 = pneg %p1462_p3 }
  0x36   : > { %751 = vrot.lane.b32.xlu0 %v1619_v0, %s1530_s5 }
  0x37   : > { %753 = vrot.lane.b32.xlu1 %v1651_v12, %s1530_s5  ;;  %1440 = vset.pattern.permute.xlu0 %v1531_v63  ;;  %p1470_p8 = pnand %p1469_p7, %p1463_p4 }
  0x38   : > { %1307 = vmatpush3.bf16.msra.mxu1 %v1674_v18  ;;  %1441 = vset.pattern.permute.xlu1 %v1531_v63 }
  0x39   : > { %1309 = vmatprep.subr.bf16.mxu1 %v1682_v21 }
  0x3c   : > { %1311 = vmatpush3.bf16.msra.mxu1 %v1682_v21 }
  0x3d   : > { %1313 = vmatprep.subr.bf16.mxu1 %v1688_v24 }
  0x40   : > { %1315 = vmatpush3.bf16.msra.mxu1 %v1688_v24 }
  0x41   : > { %1317 = vmatprep.subr.bf16.mxu1 %v1694_v27 }
  0x44   : > { %1319 = vmatpush3.bf16.msra.mxu1 %v1694_v27 }
  0x45   : > { %1321 = vmatprep.subr.bf16.mxu1 %v1700_v30 }
  0x48   : > { %1323 = vmatpush3.bf16.msra.mxu1 %v1700_v30 }
  0x49   : > { %1364 = vmatprep.subr.bf16.mxu1 %v1532_v1 }
  0x9d   : > { %v321_v36 = vpop.permute.xlu0 %320 }
  0x9e   : > { %v329_v39 = vpop.permute.xlu1 %328 }
  0xa1   : > { %v325_v37 = vpop.permute.xlu0 %324 }
  0xa2   : > { %v333_v45 = vpop.permute.xlu1 %332 }
  0xa5   : > { %v425_v38 = vpop.permute.xlu0 %424 }
  0xa6   : > { %1208 = vmatprep.mubr.msk.f32.mxu0 %vm432_vm1, %v425_v38  ;;  %v427_v55 = vpop.permute.xlu1 %426 }
  0xa9   : > { %v429_v56 = vpop.permute.xlu0 %428 }
  0xaa   : > { %v431_v57 = vpop.permute.xlu1 %430 }
  0xad   : > { %v528_v8 = vpop.permute.xlu0 %527 }
  0xae   : > { %v532_v10 = vpop.permute.xlu1 %531 }
  0xb1   : > { %v540_v19 = vpop.permute.xlu0 %539 }
  0xb2   : > { %v536_v22 = vpop.permute.xlu1 %535 }
 0x103   : > { %v1158_v32 = vpop.f32.mrb[0].mxu0 }
 0x104   : > { %v300_v33 = vpop.f32.mrb[1].mxu0 }
 0x105   : > { %1194 = vmatprep.mubr.f32.mxu1 %v300_v33 }
 0x106   : > { %1195 = vmatmul.mubr.f32.vlgmr.msra.gmra.mrb[0].mxu1 %v1158_v32 }
 0x107   : > { %v1161_v34 = vpop.f32.mrb[2].mxu0 }
 0x108   : > { %v310_v35 = vpop.f32.mrb[3].mxu0 }
 0x109   : > { %1197 = vmatprep.mubr.f32.mxu1 %v310_v35  ;;  %v752_v35 = vpop.permute.xlu0 %751 }
 0x10a   : > { %1198 = vmatmul.mubr.f32.gmra.mrb[2].mxu1 %v1161_v34  ;;  %v1757_v34 = vld [vmem:[%s1851_s3 + $0x20] sm:$0xff] }
 0x10b   : > { %1260 = vmatprep.mubr.msk.f32.mxu1 %vm1533_vm2, %v1534_v2 }
 0x1d9   : > { %v1196_v40 = vpop.f32.mrb[0].mxu1 }
 0x1da   : > { %v407_v41 = vadd.f32 %v1196_v40, %v325_v37  ;;  %v401_v42 = vpop.f32.mrb[1].mxu1  ;;  %v633_v37 = vstv %s1772_s9 }
 0x1db   : > { %v402_v43 = vadd.f32 %v401_v42, %v321_v36  ;;  %v1774_v36 = vand.u32 127, %v631_v3 }
 0x1dc   : > { %v421_v44 = vmax.f32 %v407_v41, 0.0 }
 0x1dd   : > { %v420_v46 = vmax.f32 %v402_v43, 0.0  ;;  %v1199_v47 = vpop.f32.mrb[2].mxu1  ;;  %vm1780_vm5 = vcmp.lt.s32.totalorder %v1774_v36, %v633_v37  ;;  %vm945_vm7 = vcmp.eq.s32.totalorder %v1774_v36, %v633_v37  ;;  %vm964_vm9 = vcmp.eq.s32.totalorder %v1774_v36, 127 }
 0x1de   : > { %v417_v48 = vadd.f32 %v1199_v47, %v333_v45  ;;  %v411_v49 = vpop.f32.mrb[3].mxu1 }
 0x1df   : > { %v1324_v50 = vpack.c.bf16 %v421_v44, %v420_v46  ;;  %v412_v51 = vadd.f32 %v411_v49, %v329_v39 }
 0x1e0   : > { %v423_v52 = vmax.f32 %v417_v48, 0.0 }
 0x1e1   : > { %v422_v53 = vmax.f32 %v412_v51, 0.0  ;;  %1325 = vmatprep.subr.bf16.mxu0 %v1324_v50 }
 0x1e2   : > { %1327 = vmatpush3.bf16.msra.mxu0 %v1324_v50 }
 0x1e3   : > { %v1328_v54 = vpack.c.bf16 %v423_v52, %v422_v53  ;;  %v868_v53 = vrot.slane %v1757_v34, 3 }
 0x1e5   : > { %1329 = vmatprep.subr.bf16.mxu0 %v1328_v54 }
 0x1e6   : > { %1331 = vmatpush3.bf16.msra.mxu0 %v1328_v54 }
 0x1e7   : > { %1333 = vmatprep.subr.bf16.mxu0 %v1639_v6 }
 0x1e9   : > { %1209 = vmatmul.mubr.msk.f32.vlgmr.msra.gmra.mrb[4].mxu0 %vm432_vm1, %v427_v55 }
 0x1ea   : > { %1211 = vmatprep.mubr.msk.f32.mxu0 %vm432_vm1, %v429_v56  ;;  %1335 = vmatpush3.bf16.msra.mxu0 %v1639_v6  ;;  %v732_v6 = vsub.s32 0, %v731_v5 }
 0x1eb   : > { %1337 = vmatprep.subr.bf16.mxu0 %v1645_v11 }
 0x1ec   : > { %v733_v9 = vrot.slane %v729_v7, %v732_v6 }
 0x1ed   : > { %1212 = vmatmul.mubr.msk.f32.gmra.mrb[6].mxu0 %vm432_vm1, %v431_v57 }
 0x1ee   : > { %1339 = vmatpush3.bf16.msra.mxu0 %v1645_v11  ;;  %vm734_vm4 = vcmp.eq.s32.totalorder %v733_v9, 1 }
 0x1ef   : > { %1341 = vmatprep.subr.bf16.mxu0 %v1654_v13 }
 0x1f2   : > { %1343 = vmatpush3.bf16.msra.mxu0 %v1654_v13 }
 0x1f3   : > { %1345 = vmatprep.subr.bf16.mxu0 %v1674_v18 }
 0x1f6   : > { %1347 = vmatpush3.bf16.msra.mxu0 %v1674_v18 }
 0x1f7   : > { %1349 = vmatprep.subr.bf16.mxu0 %v1682_v21 }
 0x1fa   : > { %1351 = vmatpush3.bf16.msra.mxu0 %v1682_v21 }
 0x1fb   : > { %1353 = vmatprep.subr.bf16.mxu0 %v1688_v24 }
 0x1fe   : > { %1355 = vmatpush3.bf16.msra.mxu0 %v1688_v24 }
 0x1ff   : > { %1357 = vmatprep.subr.bf16.mxu0 %v1694_v27 }
 0x202   : > { %1359 = vmatpush3.bf16.msra.mxu0 %v1694_v27 }
 0x203   : > { %1361 = vmatprep.subr.bf16.mxu0 %v1700_v30 }
 0x206   : > { %1363 = vmatpush3.bf16.msra.mxu0 %v1700_v30 }
 0x207   : > { %1378 = vmatprep.subr.bf16.mxu0 %v1532_v1 }
 0x2bc   : > { %v1210_v59 = vpop.f32.mrb[4].mxu0 }
 0x2bd   : > { %v507_v60 = vpop.f32.mrb[5].mxu0 }
 0x2be   : > { %1246 = vmatprep.mubr.f32.mxu0 %v507_v60 }
 0x2bf   : > { %1247 = vmatmul.mubr.f32.vlgmr.msra.gmra.mrb[8].mxu0 %v1210_v59 }
 0x2c0   : > { %v1213_v61 = vpop.f32.mrb[6].mxu0 }
 0x2c1   : > { %v517_v62 = vpop.f32.mrb[7].mxu0 }
 0x2c2   : > { %1249 = vmatprep.mubr.f32.mxu0 %v517_v62 }
 0x2c3   : > { %1250 = vmatmul.mubr.f32.gmra.mrb[10].mxu0 %v1213_v61 }
 0x2c4   : > { %1285 = vmatprep.mubr.msk.f32.mxu0 %vm1533_vm2, %v1534_v2 }
 0x392   : > { %v1248_v11 = vpop.f32.mrb[8].mxu0 }
 0x393   : > { %v614_v13 = vadd.f32 %v1248_v11, %v532_v10  ;;  %v608_v15 = vpop.f32.mrb[9].mxu0  ;;  %v724_v11 = vrot.slane %v1757_v34, 2 }
 0x394   : > { %v609_v16 = vadd.f32 %v608_v15, %v528_v8 }
 0x395   : > { %v628_v18 = vmax.f32 %v614_v13, 0.0 }
 0x396   : > { %v627_v20 = vmax.f32 %v609_v16, 0.0  ;;  %v1251_v21 = vpop.f32.mrb[10].mxu0 }
 0x397   : > { %v624_v23 = vadd.f32 %v1251_v21, %v540_v19  ;;  %v618_v24 = vpop.f32.mrb[11].mxu0  ;;  %v736_v25 = vsel %vm734_vm4, %v628_v18, -1e+30 }
 0x398   : > { %v1365_v26 = vpack.c.bf16 %v628_v18, %v627_v20  ;;  %v619_v27 = vadd.f32 %v618_v24, %v536_v22  ;;  %741 = vmax.xlane.f32.xlu0 %v736_v25  ;;  %v735_v28 = vsel %vm734_vm4, %v627_v20, -1e+30 }
 0x399   : > { %v630_v29 = vmax.f32 %v624_v23, 0.0  ;;  %739 = vmax.xlane.f32.xlu1 %v735_v28 }
 0x39a   : > { %v629_v30 = vmax.f32 %v619_v27, 0.0  ;;  %1366 = vmatpush3.bf16.msra.mxu1 %v1365_v26 }
 0x39b   : > { %v738_v31 = vsel %vm734_vm4, %v630_v29, -1e+30  ;;  %1367 = vmatprep.subr.bf16.mxu1 %v1532_v1 }
 0x39c   : > { %v1368_v32 = vpack.c.bf16 %v630_v29, %v629_v30  ;;  %v737_v33 = vsel %vm734_vm4, %v629_v30, -1e+30 }
 0x39d   : > { %743 = vmax.xlane.f32.xlu0 %v737_v33  ;;  %745 = vmax.xlane.f32.xlu1 %v738_v31 }
 0x39e   : > { %1369 = vmatpush3.bf16.msra.mxu1 %v1368_v32 }
 0x3a1   : > { %1261 = vmatmul.mubr.msk.f32.vlgmr.msra.gmra.mrb[4].mxu1 %vm432_vm1, %v1757_v34 }
 0x3a2   : > { %1271 = vmatprep.mubr.msk.f32.mxu1 %vm432_vm1, %v752_v35 }
 0x3ae   : > { %755 = vrot.lane.b32.xlu1 %v1659_v14, %s1530_s5 }
 0x3b2   : > { %759 = vrot.lane.b32.xlu1 %v1619_v0, %s1535_s8  ;;  %v715_v0 = vsel %vm1780_vm5, 1.0, %v1534_v2 }
 0x3b3   : > { %757 = vrot.lane.b32.xlu0 %v1671_v17, %s1530_s5 }
 0x3b6   : > { %763 = vrot.lane.b32.xlu1 %v1659_v14, %s1535_s8 }
 0x3b7   : > { %761 = vrot.lane.b32.xlu0 %v1651_v12, %s1535_s8  ;;  %v754_v12 = vpop.permute.xlu1 %753 }
 0x3ba   : > { %869 = vrot.lane.b32.xlu1 %v868_v53, %s1536_s10 }
 0x3bb   : > { %765 = vrot.lane.b32.xlu0 %v1671_v17, %s1535_s8 }
 0x3bf   : > { %709 = vperm.xlu0 %1440, %v1757_v34  }
 0x3de   : > { %716 = vadd.xlane.f32.xlu0 %v715_v0 }
 0x425   : > { %v742_v14 = vpop.xlane.xlu0 %741 }
 0x426   : > { %v748_v17 = vmax.f32 %v742_v14, -10000.0  ;;  %v740_v39 = vpop.xlane.xlu1 %739 }
 0x427   : > { %v747_v40 = vmax.f32 %v740_v39, -10000.0 }
 0x429   : > { %v1370_v41 = vpack.c.bf16 %v748_v17, %v747_v40 }
 0x42a   : > { %v744_v42 = vpop.xlane.xlu0 %743  ;;  %v746_v43 = vpop.xlane.xlu1 %745 }
 0x42b   : > { %v749_v44 = vmax.f32 %v744_v42, -10000.0  ;;  %v750_v45 = vmax.f32 %v746_v43, -10000.0  ;;  %1371 = vmatprep.subr.bf16.mxu1 %v1370_v41 }
 0x42c   : > { %1373 = vmatpush3.bf16.msra.mxu1 %v1370_v41 }
 0x42d   : > { %v1374_v46 = vpack.c.bf16 %v750_v45, %v749_v44 }
 0x42e   : > { %v756_v47 = vpop.permute.xlu1 %755  ;;  %v758_v48 = vpop.permute.xlu0 %757 }
 0x42f   : > { %1375 = vmatprep.subr.bf16.mxu1 %v1374_v46 }
 0x430   : > { %1377 = vmatpush3.bf16.msra.mxu1 %v1374_v46 }
 0x432   : > { %v760_v54 = vpop.permute.xlu1 %759  ;;  %v762_v55 = vpop.permute.xlu0 %761 }
 0x433   : > { %1272 = vmatmul.mubr.msk.f32.vlgmr.msra.gmra.mrb[6].mxu1 %vm432_vm1, %v754_v12 }
 0x434   : > { %1274 = vmatprep.mubr.msk.f32.mxu1 %vm432_vm1, %v756_v47 }
 0x436   : > { %v764_v61 = vpop.permute.xlu1 %763  ;;  %v766_v62 = vpop.permute.xlu0 %765 }
 0x437   : > { %1275 = vmatmul.mubr.msk.f32.gmra.mrb[8].mxu1 %vm432_vm1, %v758_v48 }
 0x43a   : > { %v870_v13 = vpop.permute.xlu1 %869 }
 0x43e   : > { %v710_v19 = vpop.permute.xlu0 %709 }
 0x43f   : > { %v711_v20 = vrot.slane %v710_v19, 3 }
 0x46b   : > { %v717_v30 = vpop.xlane.xlu0 %716 }
 0x474   : > { %v704_v49 = vpop.f32.mrb[4].mxu1 }
 0x475   : > { %v1262_v50 = vpop.f32.mrb[5].mxu1  ;;  %v714_v51 = vsel %vm1780_vm5, %v704_v49, 0.0  ;;  %v713_v21 = vadd.f32 %v711_v20, %v704_v49 }
 0x476   : > { %v719_v52 = vsel %vm718_vm6, %v714_v51, 0.0 }
 0x477   : > { %720 = vadd.xlane.f32.xlu0 %v719_v52 }
 0x504   : > { %v721_v32 = vpop.xlane.xlu0 %720 }
 0x506   : > { %v1273_v56 = vpop.f32.mrb[6].mxu1 }
 0x507   : > { %v851_v57 = vadd.f32 %v1273_v56, %v762_v55  ;;  %v845_v58 = vpop.f32.mrb[7].mxu1 }
 0x508   : > { %v846_v59 = vadd.f32 %v845_v58, %v760_v54 }
 0x509   : > { %v865_v60 = vmax.f32 %v851_v57, 0.0 }
 0x50a   : > { %v864_v63 = vmax.f32 %v846_v59, 0.0  ;;  %v1276_v2 = vpop.f32.mrb[8].mxu1 }
 0x50b   : > { %v861_v3 = vadd.f32 %v1276_v2, %v766_v62  ;;  %v855_v5 = vpop.f32.mrb[9].mxu1 }
 0x50c   : > { %v1379_v6 = vpack.c.bf16 %v865_v60, %v864_v63  ;;  %v856_v7 = vadd.f32 %v855_v5, %v764_v61 }
 0x50d   : > { %v867_v8 = vmax.f32 %v861_v3, 0.0 }
 0x50e   : > { %v866_v9 = vmax.f32 %v856_v7, 0.0  ;;  %1380 = vmatpush3.bf16.msra.mxu0 %v1379_v6 }
 0x50f   : > { %1381 = vmatprep.subr.bf16.mxu0 %v1532_v1  ;;  %v944_v1 = vsel %vm215_vm3, %v713_v21, -1e+30 }
 0x510   : > { %v1382_v10 = vpack.c.bf16 %v867_v8, %v866_v9 }
 0x512   : > { %1383 = vmatpush3.bf16.msra.mxu0 %v1382_v10 }
 0x515   : > { %1286 = vmatmul.mubr.msk.f32.vlgmr.msra.gmra.mrb[12].mxu0 %vm432_vm1, %v724_v11 }
 0x5e8   : > { %v940_v15 = vpop.f32.mrb[12].mxu0 }
 0x5e9   : > { %v941_v16 = vadd.f32 %v940_v15, %v870_v13  ;;  %v1287_v18 = vpop.f32.mrb[13].mxu0 }
 0x5eb   : > { %948 = vperm.xlu1 %1441, %v941_v16  }
 0x66a   : > { %v949_v22 = vpop.permute.xlu1 %948 }
 0x66b   : > { %v951_v23 = vsel %vm945_vm7, %v949_v22, %v944_v1 }
 0x66c   : > { %v953_v24 = vsel %vm952_vm8, %v951_v23, -inf }
 0x66d   : > { %954 = vmax.xlane.f32.xlu1 %v953_v24 }
 0x67e   : > { %725 = vrot.lane.b32.xlu1 %v724_v11, %s1537_s11 }
 0x6fa   : > { %v955_v25 = vpop.xlane.xlu1 %954 }
 0x6fb   : > { %v956_v26 = vsub.f32 %v951_v23, %v955_v25 }
 0x6fd   : > { %v957_v27 = vmul.f32 1.442695, %v956_v26 }
 0x6fe   : > { %v726_v4 = vpop.permute.xlu1 %725 }
 0x6ff   : > { %1442 = vpow2.f32 %v957_v27 }
 0x700   : > { %1444 = vrcp.f32 %v717_v30 }
 0x709   : > { %v1443_v28 = vpop.eup %1442 }
 0x70a   : > { %v959_v29 = vsel %vm952_vm8, %v1443_v28, 0.0  ;;  %v1445_v31 = vpop.eup %1444 }
 0x70b   : > { %960 = vadd.xlane.f32.xlu0 %v959_v29  ;;  %v723_v33 = vmul.f32 %v1445_v31, %v721_v32 }
 0x70d   : > { %v728_v34 = vadd.f32 %v726_v4, %v723_v33 }
 0x721   : > { %967 = vperm.xlu0 %1440, %v728_v34  }
 0x798   : > { %v961_v35 = vpop.xlane.xlu0 %960 }
 0x799   : > { %1446 = vrcp.f32 %v961_v35 }
 0x7a0   : > { %v968_v12 = vpop.permute.xlu0 %967 }
 0x7a3   : > { %v1447_v37 = vpop.eup %1446 }
 0x7a4   : > { %v963_v38 = vmul.f32 %v1447_v37, %v1443_v28 }
 0x7a6   : > { %v971_v0 = vrot.slane %v963_v38, 7 }
 0x7a8   : > { %v973_v14 = vsel %vm964_vm9, %v968_v12, %v971_v0 }
 0x7a9   : > { %974 = vst [vmem:[%s184_s14 - $0x1] sm:$0x2] %v973_v14 }
 0x7aa   : > { %1473 = shalt.err (!%p1470_p8)
}
 0x7ab   : > { %s1474_s5 = scalar_lea.hbm %s1806_s18, 16  ;;  %s1478_s8 = scalar_lea.hbm %s1852_s4, 64 }
 0x7ac   : > { %p1475_p9 = scmp.ne.s32.totalorder %s1806_s18, %s1474_s5  ;;  %p1479_p0 = scmp.lt.u32.totalorder %s1806_s18, %s1852_s4 }
 0x7ad   : > { %p1480_p1 = scmp.lt.u32.totalorder %s1478_s8, %s1474_s5  ;;  %p1482_p3 = scmp.lt.u32.totalorder %s1474_s5, %s1806_s18 }
 0x7ae   : > { %p1476_p12 = pnand %p1475_p9, %p1605_p10 }
 0x7af   : > { %p1481_p2 = por %p1480_p1, %p1479_p0 }
 0x7b0   : > { %p1477_p13 = pneg %p1476_p12 }
 0x7b1   : > { %p1483_p4 = por %p1482_p3, %p1481_p2 }
 0x7b3   : > { %p1484_p5 = pnand %p1483_p4, %p1477_p13 }
 0x7b5   : > { %1487 = shalt.err (!%p1484_p5)
}
 0x7b6   : > { %1385 = dma.vmem_to_hbm [thread:$0]  (%p1605_p10), %s1808_s15, 16, %s1806_s18, %s976_s19  }
 0x7b7 PF: > { %p1391_p6 = scmp.ge.s32.totalorder %s1524_s22, 2  ;;  %s1000_s11 = sand.u32 1, %s1512_s20  }
 0x7b8   : > { %s1001_s12 = scalar_lea.sflag [#allocation5], %s1000_s11 }
 0x7b9   : > { %p1388_p7 = pnand %p1391_p6, %p1609_p11 }
 0x7bb   : > { %1507 = dma.done.wait (!%p1388_p7), %s1001_s12, 16  }
 0x7bc   : > { %1509 = vsyncadd (!%p1388_p7), %s1001_s12, 4294967280  ;;  %p20_p8 = scmp.ge.s32.totalorder %s1592_s25, 6   ;;  %s1857_s20 = smov %s1516_s21 }
 0x7bd   : > { %s1858_s21 = smov %s1520_s0  ;;  %s1859_s0 = smov %s1603_s28 }
 0x7be   : > { %s1860_s22 = smov %s1592_s25  ;;  %22 = sbr.rel (!%p20_p8) target bundleno = 18 (0x12), region = 70 }
 0x7c5   :  { %1005 = vsyncpa [#allocation5], 1 }
 0x7c6   :  { %1007 = vsyncpa [#allocation5 + $0x1], 1 }

</bundles_post_ra>
